<compile_context>
chip_gen: v5e
topology: v5e:2x2
jax: 0.10.0
libtpu: 0.0.40
codegen_flags: <defaults>
</compile_context>

<pallas_src>
import jax
import jax.numpy as jnp
from jax.experimental import pallas as pl
from jax.experimental.pallas import tpu as pltpu

# Target for the *estimated live* VMEM per grid step (see budget math below).
_VMEM_LIVE_BUDGET = 24 * 1024 * 1024
_VMEM_LIMIT_BYTES = 48 * 1024 * 1024   # safe on v7x (64 MiB) and v5e/v6e (128 MiB)


def _batch_tile(N, C, H, W, itemsize):
    """Largest divisor of N whose per-step live VMEM fits the budget."""
    # Live per grid step, per image in the tile:
    #   2 * C*H*W*itemsize   input block (double-buffered by the pipeline)
    #   ~8 * H*W*4           f32 temporaries: gray, row/col iota masks,
    #                        rolled neighbours, edge/|edge|  (conservative)
    # plus a tiny double-buffered (1, W) f32 output block.
    per_img = 2 * C * H * W * itemsize + 8 * H * W * 4
    cap = int(max(1, (_VMEM_LIVE_BUDGET - 2 * W * 4) // per_img))
    if N >= 2:
        cap = min(cap, -(-N // 2))     # keep >=2 grid steps (v7x: one per TC)
    cap = min(cap, N)
    for bt in range(cap, 0, -1):       # largest divisor of N <= cap
        if N % bt == 0:
            return bt
    return 1


def sharpness_loss(x):
    """x: (N, C, H, W), C in {1, 3}.  Returns the scalar loss as float32."""
    N, C, H, W = x.shape
    if C not in (1, 3):
        # PyTorch's conv2d with a (1,1,3,3) kernel would fail for other C.
        raise ValueError(f"SharpenessLoss requires C in {{1, 3}}, got C={C}")

    bt = _batch_tile(N, C, H, W, jnp.dtype(x.dtype).itemsize)
    num_tiles = N // bt
    # TODO(synk): row-tile with a 1-row halo when a single image (plus its f32
    # temporaries) alone exceeds the VMEM budget (e.g. 3x4096x4096 on v7x).

    def kernel(x_ref, o_ref):
        # Fused grayscale + cast: slice channels from the ref so no full
        # (bt, C, H, W) float32 temporary is ever materialized.
        if C == 3:
            gray = (0.299 * x_ref[:, 0, :, :].astype(jnp.float32)
                    + 0.587 * x_ref[:, 1, :, :].astype(jnp.float32)
                    + 0.114 * x_ref[:, 2, :, :].astype(jnp.float32))
        else:
            gray = x_ref[:, 0, :, :].astype(jnp.float32)          # (bt, H, W)

        # Register-level 5-point Laplacian stencil.  Neighbours via pltpu.roll
        # (XLU); the conv's zero padding via jnp.where selects (VPU) that zero
        # the wrapped row / column.  No padded VMEM scratch, no offset stores.
        row = jax.lax.broadcasted_iota(jnp.int32, (bt, H, W), 1)
        col = jax.lax.broadcasted_iota(jnp.int32, (bt, H, W), 2)
        up = jnp.where(row > 0, pltpu.roll(gray, shift=1, axis=1), 0.0)
        down = jnp.where(row < H - 1, pltpu.roll(gray, shift=H - 1, axis=1), 0.0)
        left = jnp.where(col > 0, pltpu.roll(gray, shift=1, axis=2), 0.0)
        right = jnp.where(col < W - 1, pltpu.roll(gray, shift=W - 1, axis=2), 0.0)
        edge = up + down + left + right - 4.0 * gray              # (bt, H, W)

        # Partial reduction only: batch (pure VPU vreg adds) then rows (one
        # sublane reduce).  The single cross-lane reduce over the tiny
        # (num_tiles, 1, W) partials array happens once, in the wrapper.
        part = jnp.sum(jnp.abs(edge), axis=0)                     # (H, W)
        o_ref[0] = jnp.sum(part, axis=0, keepdims=True)           # (1, W)

    partials = pl.pallas_call(
        kernel,
        out_shape=jax.ShapeDtypeStruct((num_tiles, 1, W), jnp.float32),
        grid_spec=pltpu.PrefetchScalarGridSpec(
            num_scalar_prefetch=0,
            grid=(num_tiles,),
            in_specs=[pl.BlockSpec((bt, C, H, W), lambda b: (b, 0, 0, 0))],
            out_specs=pl.BlockSpec((1, 1, W), lambda b: (b, 0, 0)),
        ),
        compiler_params=pltpu.CompilerParams(
            # Batch tiles are independent.  On multi-TensorCore chips (v7x)
            # this axis can be switched to pltpu.CORE_PARALLEL to split tiles
            # across the two cores.
            dimension_semantics=("parallel",),
            vmem_limit_bytes=_VMEM_LIMIT_BYTES,
        ),
    )(x)

    total = jnp.sum(partials)                    # tiny (num_tiles, 1, W) reduce
    return (-total / jnp.float32(N * H * W)).astype(jnp.float32)


def _reference(x):
    """Pure-JAX reference matching the PyTorch forward exactly."""
    x = x.astype(jnp.float32)
    if x.shape[1] == 3:
        x = 0.299 * x[:, 0:1] + 0.587 * x[:, 1:2] + 0.114 * x[:, 2:3]
    k = jnp.array([[0, 1, 0], [1, -4, 1], [0, 1, 0]], jnp.float32).reshape(1, 1, 3, 3)
    edge = jax.lax.conv_general_dilated(
        x, k, window_strides=(1, 1), padding=((1, 1), (1, 1)),
        dimension_numbers=("NCHW", "OIHW", "NCHW"))
    return -jnp.mean(jnp.abs(edge))


if __name__ == "__main__":
    key = jax.random.PRNGKey(0)
    x = jax.random.uniform(key, (2, 3, 16, 16), dtype=jnp.float32)

    loss = jax.block_until_ready(sharpness_loss(x))
    ref = jax.block_until_ready(_reference(x))
    assert jnp.allclose(loss, ref, atol=1e-4, rtol=1e-4), (loss, ref)

    print("KERNEL_OK")
</pallas_src>

<mosaic_0001>
module attributes {stable_mosaic.version = 11 : i64} {
  func.func @kernel(%arg0: i32, %arg1: memref<1x3x16x16xf32, #tpu.memory_space<vmem>>, %arg2: memref<1x1x16xf32, #tpu.memory_space<vmem>>) attributes {dimension_semantics = [#tpu.dimension_semantics<parallel>], iteration_bounds = array<i64: 2>, scalar_prefetch = 0 : i64, scratch_operands = 0 : i64, tpu.core_type = #tpu.core_type<tc>, window_params = [{transform_indices = @transform_0, window_bounds = array<i64: 1, 3, 16, 16>}, {transform_indices = @transform_1, window_bounds = array<i64: 1, 1, 16>}]} {
    %c0 = arith.constant 0 : index
    %c0_0 = arith.constant 0 : index
    %c0_1 = arith.constant 0 : index
    %c0_2 = arith.constant 0 : index
    %0 = vector.load %arg1[%c0, %c0_0, %c0_1, %c0_2] : memref<1x3x16x16xf32, #tpu.memory_space<vmem>>, vector<1x1x16x16xf32>
    %1 = vector.shape_cast %0 : vector<1x1x16x16xf32> to vector<1x16x16xf32>
    %cst = arith.constant 2.990000e-01 : f32
    %2 = vector.broadcast %cst : f32 to vector<1x16x16xf32>
    %3 = arith.mulf %2, %1 : vector<1x16x16xf32>
    %c0_3 = arith.constant 0 : index
    %c1 = arith.constant 1 : index
    %c0_4 = arith.constant 0 : index
    %c0_5 = arith.constant 0 : index
    %4 = vector.load %arg1[%c0_3, %c1, %c0_4, %c0_5] : memref<1x3x16x16xf32, #tpu.memory_space<vmem>>, vector<1x1x16x16xf32>
    %5 = vector.shape_cast %4 : vector<1x1x16x16xf32> to vector<1x16x16xf32>
    %cst_6 = arith.constant 5.870000e-01 : f32
    %6 = vector.broadcast %cst_6 : f32 to vector<1x16x16xf32>
    %7 = arith.mulf %6, %5 : vector<1x16x16xf32>
    %8 = arith.addf %3, %7 : vector<1x16x16xf32>
    %c0_7 = arith.constant 0 : index
    %c2 = arith.constant 2 : index
    %c0_8 = arith.constant 0 : index
    %c0_9 = arith.constant 0 : index
    %9 = vector.load %arg1[%c0_7, %c2, %c0_8, %c0_9] : memref<1x3x16x16xf32, #tpu.memory_space<vmem>>, vector<1x1x16x16xf32>
    %10 = vector.shape_cast %9 : vector<1x1x16x16xf32> to vector<1x16x16xf32>
    %cst_10 = arith.constant 1.140000e-01 : f32
    %11 = vector.broadcast %cst_10 : f32 to vector<1x16x16xf32>
    %12 = arith.mulf %11, %10 : vector<1x16x16xf32>
    %13 = arith.addf %8, %12 : vector<1x16x16xf32>
    %14 = tpu.iota {dimensions = array<i32: 1>} : vector<1x16x16xi32>
    %15 = tpu.iota {dimensions = array<i32: 2>} : vector<1x16x16xi32>
    %c0_i32 = arith.constant 0 : i32
    %16 = vector.broadcast %c0_i32 : i32 to vector<1x16x16xi32>
    %17 = arith.cmpi sgt, %14, %16 : vector<1x16x16xi32>
    %c1_i32 = arith.constant 1 : i32
    %18 = tpu.dynamic_rotate %13 by %c1_i32 dim 1 : vector<1x16x16xf32>, i32 -> vector<1x16x16xf32>
    %cst_11 = arith.constant 0.000000e+00 : f32
    %19 = vector.broadcast %cst_11 : f32 to vector<1x16x16xf32>
    %20 = arith.select %17, %18, %19 : vector<1x16x16xi1>, vector<1x16x16xf32>
    %c15_i32 = arith.constant 15 : i32
    %21 = vector.broadcast %c15_i32 : i32 to vector<1x16x16xi32>
    %22 = arith.cmpi slt, %14, %21 : vector<1x16x16xi32>
    %c15_i32_12 = arith.constant 15 : i32
    %23 = tpu.dynamic_rotate %13 by %c15_i32_12 dim 1 : vector<1x16x16xf32>, i32 -> vector<1x16x16xf32>
    %cst_13 = arith.constant 0.000000e+00 : f32
    %24 = vector.broadcast %cst_13 : f32 to vector<1x16x16xf32>
    %25 = arith.select %22, %23, %24 : vector<1x16x16xi1>, vector<1x16x16xf32>
    %c0_i32_14 = arith.constant 0 : i32
    %26 = vector.broadcast %c0_i32_14 : i32 to vector<1x16x16xi32>
    %27 = arith.cmpi sgt, %15, %26 : vector<1x16x16xi32>
    %c1_i32_15 = arith.constant 1 : i32
    %28 = tpu.dynamic_rotate %13 by %c1_i32_15 dim 2 : vector<1x16x16xf32>, i32 -> vector<1x16x16xf32>
    %cst_16 = arith.constant 0.000000e+00 : f32
    %29 = vector.broadcast %cst_16 : f32 to vector<1x16x16xf32>
    %30 = arith.select %27, %28, %29 : vector<1x16x16xi1>, vector<1x16x16xf32>
    %c15_i32_17 = arith.constant 15 : i32
    %31 = vector.broadcast %c15_i32_17 : i32 to vector<1x16x16xi32>
    %32 = arith.cmpi slt, %15, %31 : vector<1x16x16xi32>
    %c15_i32_18 = arith.constant 15 : i32
    %33 = tpu.dynamic_rotate %13 by %c15_i32_18 dim 2 : vector<1x16x16xf32>, i32 -> vector<1x16x16xf32>
    %cst_19 = arith.constant 0.000000e+00 : f32
    %34 = vector.broadcast %cst_19 : f32 to vector<1x16x16xf32>
    %35 = arith.select %32, %33, %34 : vector<1x16x16xi1>, vector<1x16x16xf32>
    %36 = arith.addf %20, %25 : vector<1x16x16xf32>
    %37 = arith.addf %36, %30 : vector<1x16x16xf32>
    %38 = arith.addf %37, %35 : vector<1x16x16xf32>
    %cst_20 = arith.constant 4.000000e+00 : f32
    %39 = vector.broadcast %cst_20 : f32 to vector<1x16x16xf32>
    %40 = arith.mulf %39, %13 : vector<1x16x16xf32>
    %41 = arith.subf %38, %40 : vector<1x16x16xf32>
    %42 = math.absf %41 : vector<1x16x16xf32>
    %cst_21 = arith.constant dense<0.000000e+00> : vector<16x16xf32>
    %43 = vector.multi_reduction <add>, %42, %cst_21 [0] : vector<1x16x16xf32> to vector<16x16xf32>
    %cst_22 = arith.constant dense<0.000000e+00> : vector<16xf32>
    %44 = vector.multi_reduction <add>, %43, %cst_22 [0] : vector<16x16xf32> to vector<16xf32>
    %45 = vector.shape_cast %44 : vector<16xf32> to vector<1x16xf32>
    %c0_23 = arith.constant 0 : index
    %c0_24 = arith.constant 0 : index
    %c0_25 = arith.constant 0 : index
    %46 = vector.load %arg2[%c0_23, %c0_24, %c0_25] : memref<1x1x16xf32, #tpu.memory_space<vmem>>, vector<1x1x16xf32>
    %47 = vector.shape_cast %46 : vector<1x1x16xf32> to vector<1x16xf32>
    %48 = vector.shape_cast %45 : vector<1x16xf32> to vector<1x1x16xf32>
    tpu.vector_store %arg2[%c0_23, %c0_24, %c0_25], %48 {strides = array<i32>} : memref<1x1x16xf32, #tpu.memory_space<vmem>>, vector<1x1x16xf32>,
    return
  }
  func.func @transform_0(%arg0: i32) -> (i32, i32, i32, i32) {
    %c0_i32 = arith.constant 0 : i32
    %c0_i32_0 = arith.constant 0 : i32
    %c0_i32_1 = arith.constant 0 : i32
    %c0_i32_2 = arith.constant 0 : i32
    return %arg0, %c0_i32, %c0_i32_0, %c0_i32_1 : i32, i32, i32, i32
  }
  func.func @transform_1(%arg0: i32) -> (i32, i32, i32) {
    %c0_i32 = arith.constant 0 : i32
    %c0_i32_0 = arith.constant 0 : i32
    %c0_i32_1 = arith.constant 0 : i32
    return %arg0, %c0_i32, %c0_i32_0 : i32, i32, i32
  }
}

</mosaic_0001>

<bundles_post_ra>
// kernel: tpu_custom_call.1
= control target key start
LH: loop header
LB: loop body
LE: loop exit
PB: predicated region body
PF: predicated region fallthrough
CT: control target
= control target key end

     0   :  { %6 = vsyncpa [#allocation3], 0  ;;  %s615_s0 = inlined_call_operand.hbm [shape: f32[2,3,16,16], index: 0, kind: input, shape index: {}]   ;;  %s616_s1 = inlined_call_operand.hbm [shape: f32[2,1,16], index: 1, kind: output, shape index: {}]  }
   0x1   :  { %8 = vsyncpa [#allocation3 + $0x1], 0 }
   0x2   :  { %9 = vsyncpa [#allocation4], 0 }
   0x3   :  { %11 = vsyncpa [#allocation4 + $0x1], 0  ;;  %s493_s6 = smov 0   ;;  %s495_s7 = smov 0  }
   0x4   :  { %s497_s8 = smov 0   ;;  %s499_s9 = smov 0  }
   0x5 LB: > { %s514_s10 = sadd.s32 4294967295, %s476_s9   ;;  %s315_s11 = sadd.s32 4294967294, %s476_s9   ;;  %s476_s9 = sphi %s499_s9, %s624_s9   ;;  %s472_s8 = sphi %s497_s8, %s623_s8   ;;  %s468_s7 = sphi %s495_s7, %s622_s7   ;;  %s464_s6 = sphi %s493_s6, %s621_s6  }
   0x6   : > { %s518_s12 = sadd.s32 1, %s476_s9   ;;  %s24_s13 = sadd.s32 1, %s472_s8 }
   0x7   : > { %s21_s14 = ssub.s32 %s476_s9, %s518_s12  ;;  %p31_p0 = scmp.ne.s32.totalorder %s472_s8, %s468_s7 }
   0x8   : > { %p22_p1 = scmp.eq.s32.totalorder %s21_s14, 0  ;;  %p32_p2 = scmp.eq.s32.totalorder %s476_s9, 0 }
   0x9   : > { %p37_p3 = scmp.ne.s32.totalorder %s468_s7, %s464_s6  ;;  %p38_p4 = scmp.eq.s32.totalorder %s514_s10, 0 }
   0xa   : > { %s530_s15 = scalar_select %p22_p1, %s472_s8, %s24_s13  }
   0xb   : > { %p33_p5 = por %p32_p2, %p31_p0  ;;  %p532_p6 = por %p38_p4, %p37_p3 }
   0xc   : > { %p61_p7 = scmp.eq.s32.totalorder %s514_s10, 1  ;;  %p67_p8 = scmp.eq.s32.totalorder %s315_s11, 1 }
   0xd   : > { %p317_p9 = scmp.ge.s32.totalorder %s476_s9, 2  ;;  %p341_p10 = scmp.lt.s32.totalorder %s476_s9, 2 }
   0xe   : > { %p539_p11 = por %p61_p7, %p31_p0  ;;  %p543_p12 = por %p67_p8, %p37_p3 }
   0xf   : > { %s87_s19 = sand.u32 1, %s472_s8   ;;  %s327_s20 = smul.u32 48, %s476_s9 }
  0x10   : > { %s326_s21 = smul.u32 48, %s87_s19  ;;  %p552_p13 = pnand %p341_p10, %p33_p5 }
  0x11   : > { %s96_s24 = scalar_lea.hbm %s615_s0, %s327_s20  ;;  %s88_s29 = scalar_lea.sflag [#allocation3], %s87_s19 }
  0x12   : > { %s97_s26 = sshll.u32 %s96_s24, 4  ;;  %s91_s27 = scalar_lea.vmem [#allocation2], %s326_s21  ;;  %s98_s26 = int_to_ptr.hbm [resolvable:$true] %s97_s26 }
  0x13   : > { %s99_s28 = sshll.u32 %s91_s27, 4  ;;  %s380_s30 = sshra.s32 %s98_s26, 4  ;;  %s100_s28 = int_to_ptr.vmem [resolvable:$true] %s99_s28  ;;  %s381_s30 = int_to_ptr.hbm [resolvable:$true] %s380_s30 }
  0x14   : > { %s382_s2 = scalar_lea.hbm %s381_s30, 48  ;;  %p384_p1 = pneg %p552_p13 }
  0x15   : > { %p383_p0 = scmp.ne.s32.totalorder %s381_s30, %s382_s2  ;;  %s387_s5 = scalar_lea.hbm %s615_s0, 96 }
  0x16   : > { %p388_p4 = scmp.lt.s32.totalorder %s381_s30, %s615_s0  ;;  %p389_p5 = scmp.lt.s32.totalorder %s387_s5, %s382_s2 }
  0x17   : > { %p385_p2 = pnand %p384_p1, %p383_p0 }
  0x18   : > { %p390_p7 = por %p389_p5, %p388_p4 }
  0x19   : > { %p386_p3 = pneg %p385_p2 }
  0x1b   : > { %p391_p8 = pnand %p390_p7, %p386_p3 }
  0x1d   : > { %394 = shalt.err (!%p391_p8)
}
  0x1e   : > { %s478_s14 = smov 128   ;;  %s479_s19 = smov 8  }
  0x1f   : > { %336 = dma.hbm_to_vmem [thread:$0]  (!%p552_p13), %s98_s26, 768, %s100_s28, %s88_s29, %s478_s14, %s478_s14, %s479_s19  }
  0x20   : > { %p319_p10 = scmp.ge.s32.totalorder %s476_s9, 1  ;;  %p107_p0 = scmp.lt.s32.totalorder %s476_s9, 3 }
  0x22   : > { %p108_p1 = pnand %p319_p10, %p107_p0 }
  0x23   : > { %s569_s20 = sand.u32 (!%p108_p1), 1, %s468_s7  }
  0x24   : > { %111 = sbr.rel (%p108_p1) target bundleno = 429 (0x1ad), region = 24  ;;  %s114_s22 = scalar_lea.sflag (!%p108_p1), [#allocation3], %s569_s20 }
  0x25   : > { %s328_s21 = smul.u32 (!%p108_p1), 48, %s569_s20 }
  0x27   : > { %s117_s23 = scalar_lea.vmem (!%p108_p1), [#allocation2], %s328_s21 }
  0x29   : > { %455 = dma.done.wait (%p532_p6), %s114_s22, 768  }
  0x2a   : > { %457 = vsyncadd (%p532_p6), %s114_s22, 4294966528  ;;  %v136_v0 = vld [vmem:[%s117_s23] sm:$0xff]  ;;  %v320_v1 = vld [vmem:[%s117_s23 + $0x10] sm:$0xff]  ;;  %s480_s24 = smov 16   ;;  %vm178_vm0 = vcmask 1047680   ;;  %s481_s16 = smov 127   ;;  %v154_v24 = vlaneseq }
  0x2b   : > { %v322_v2 = vld [vmem:[%s117_s23 + $0x20] sm:$0xff]  ;;  %v138_v3 = vmul.f32 0.299, %v136_v0  ;;  %v143_v4 = vmul.f32 0.587, %v320_v1  ;;  %v137_v6 = vld [vmem:[%s117_s23 + $0x8] sm:$0xff]  ;;  %s245_s28 = scalar_lea.hbm %s616_s1, %s514_s10 }
  0x2c   : > { %v150_v5 = vmul.f32 0.114, %v322_v2  ;;  %v321_v7 = vld [vmem:[%s117_s23 + $0x18] sm:$0xff]  ;;  %v139_v9 = vmul.f32 0.299, %v137_v6  ;;  %v323_v11 = vld [vmem:[%s117_s23 + $0x28] sm:$0xff] }
  0x2d   : > { %v145_v8 = vadd.f32 %v143_v4, %v138_v3  ;;  %v144_v10 = vmul.f32 0.587, %v321_v7  ;;  %v151_v14 = vmul.f32 0.114, %v323_v11  ;;  %s482_s25 = smov 113   ;;  %v155_v25 = vshrl.u32 %v154_v24, 7 }
  0x2e   : > { %v158_v30 = vand.u32 127, %v154_v24  ;;  %vm224_vm7 = vcmask 130048   ;;  %s135_s29 = scalar_lea.vmem [#allocation5], %s569_s20  ;;  %s249_s2 = sshll.u32 %s245_s28, 4  ;;  %vm234_vm8 = vcmask 122880   ;;  %s250_s2 = int_to_ptr.hbm [resolvable:$true] %s249_s2 }
  0x2f   : > { %v152_v12 = vadd.f32 %v150_v5, %v145_v8  ;;  %v146_v13 = vadd.f32 %v144_v10, %v139_v9  ;;  %vm163_vm1 = vcmp.lt.s32.totalorder %v155_v25, 1  ;;  %vm159_vm2 = vcmp.gt.s32.totalorder %v155_v25, 0  ;;  %s247_s30 = sshll.u32 %s135_s29, 4  ;;  %s237_s3 = scalar_lea.sflag [#allocation4], %s569_s20  ;;  %s248_s30 = int_to_ptr.vmem [resolvable:$true] %s247_s30 }
  0x30   : > { %vm172_vm3 = vcmp.lt.s32.totalorder %v155_v25, 7  ;;  %v156_v33 = vadd.s32 8, %v155_v25  ;;  %vm177_vm4 = vcmp.gt.s32.totalorder %v158_v30, 0  ;;  %vm201_vm6 = vcmp.lt.s32.totalorder %v158_v30, 15  ;;  %s424_s4 = sshra.s32 %s250_s2, 4  ;;  %s430_s13 = scalar_lea.hbm %s616_s1, 2  ;;  %s425_s4 = int_to_ptr.hbm [resolvable:$true] %s424_s4 }
  0x31   : > { %179 = vrot.lane.b32.xlu0 %v152_v12, %s480_s24  ;;  %v153_v15 = vadd.f32 %v151_v14, %v146_v13  ;;  %v161_v27 = vrot.slane %v152_v12, 7  ;;  %v170_v29 = vrot.slane %v152_v12, 1  ;;  %v216_v47 = vmul.f32 4.0, %v152_v12  ;;  %s426_s5 = scalar_lea.hbm %s425_s4, 1  ;;  %p431_p3 = scmp.lt.s32.totalorder %s425_s4, %s616_s1 }
  0x32   : > { %vm169_vm5 = vcmp.lt.s32.totalorder %v156_v33, 15  ;;  %p427_p6 = scmp.ne.s32.totalorder %s425_s4, %s426_s5  ;;  %p432_p4 = scmp.lt.s32.totalorder %s430_s13, %s426_s5 }
  0x33   : > { %v162_v26 = vrot.slane %v153_v15, 7  ;;  %v171_v28 = vrot.slane %v153_v15, 1  ;;  %v217_v51 = vmul.f32 4.0, %v153_v15 }
  0x34   : > { %p428_p13 = pnand %p427_p6, %p539_p11  ;;  %p433_p5 = por %p432_p4, %p431_p3 }
  0x35   : > { %v165_v32 = vsel %vm163_vm1, %v162_v26, %v161_v27  ;;  %v173_v35 = vsel %vm172_vm3, %v170_v29, %v171_v28  ;;  %v174_v37 = vsel %vm172_vm3, %v171_v28, %v170_v29  ;;  %v164_v40 = vsel %vm163_vm1, %v161_v27, %v162_v26 }
  0x36   : > { %v166_v34 = vsel %vm159_vm2, %v165_v32, 0.0  ;;  %v176_v41 = vsel %vm169_vm5, %v174_v37, 0.0  ;;  %p429_p2 = pneg %p428_p13 }
  0x37   : > { %v210_v36 = vadd.f32 %v173_v35, %v166_v34  ;;  %v211_v45 = vadd.f32 %v176_v41, %v164_v40 }
  0x38   : > { %p434_p7 = pnand %p433_p5, %p429_p2 }
  0x39   : > { %182 = vrot.lane.b32.xlu0 %v153_v15, %s480_s24 }
  0xa3   : > { %v180_v16 = vpop.permute.xlu0 %179 }
  0xa4   : > { %v181_v17 = vsel %vm178_vm0, %v180_v16, %v152_v12 }
  0xa5   : > { %185 = vrot.lane.b32.xlu1 %v181_v17, %s480_s24 }
  0xab   : > { %v183_v18 = vpop.permute.xlu0 %182 }
  0xac   : > { %v184_v19 = vsel %vm178_vm0, %v183_v18, %v153_v15 }
  0xad   : > { %187 = vrot.lane.b32.xlu1 %v184_v19, %s480_s24 }
 0x117   : > { %v186_v20 = vpop.permute.xlu1 %185 }
 0x118   : > { %v189_v21 = vsel %vm178_vm0, %v186_v20, %v152_v12 }
 0x119   : > { %202 = vrot.lane.b32.xlu0 %v189_v21, %s481_s16  ;;  %193 = vrot.lane.b32.xlu2 %v189_v21, %s482_s25 }
 0x11f   : > { %v188_v22 = vpop.permute.xlu1 %187 }
 0x120   : > { %v190_v23 = vsel %vm178_vm0, %v188_v22, %v153_v15 }
 0x121   : > { %204 = vrot.lane.b32.xlu1 %v190_v23, %s481_s16  ;;  %195 = vrot.lane.b32.xlu2 %v190_v23, %s482_s25 }
 0x173   : > { %v194_v31 = vpop.permute.xlu2 %193 }
 0x174   : > { %v199_v38 = vsel %vm177_vm4, %v194_v31, 0.0 }
 0x175   : > { %v212_v43 = vadd.f32 %v210_v36, %v199_v38 }
 0x17b   : > { %v196_v44 = vpop.permute.xlu2 %195 }
 0x17c   : > { %v200_v48 = vsel %vm177_vm4, %v196_v44, 0.0 }
 0x17d   : > { %v213_v49 = vadd.f32 %v211_v45, %v200_v48 }
 0x18b   : > { %v203_v39 = vpop.permute.xlu0 %202 }
 0x18c   : > { %v208_v42 = vsel %vm201_vm6, %v203_v39, 0.0 }
 0x18d   : > { %v214_v46 = vadd.f32 %v212_v43, %v208_v42 }
 0x18f   : > { %v218_v50 = vsub.f32 %v214_v46, %v216_v47 }
 0x191   : > { %v220_v55 = vand.u32 2147483647, %v218_v50 }
 0x193   : > { %v205_v52 = vpop.permute.xlu1 %204  ;;  %v225_v58 = vsel %vm224_vm7, %v220_v55, 0.0 }
 0x194   : > { %v209_v53 = vsel %vm201_vm6, %v205_v52, 0.0 }
 0x195   : > { %v215_v54 = vadd.f32 %v213_v49, %v209_v53 }
 0x197   : > { %v219_v56 = vsub.f32 %v215_v54, %v217_v51 }
 0x199   : > { %v221_v57 = vand.u32 2147483647, %v219_v56 }
 0x19b   : > { %v226_v59 = vsel %vm224_vm7, %v221_v57, 0.0 }
 0x19c   : > { %v227_v60 = vadd.f32 %v226_v59, %v225_v58 }
 0x19e   : > { %v228_v61 = vrot.slane %v227_v60, 4 }
 0x1a0   : > { %v229_v62 = vadd.f32 %v228_v61, %v227_v60 }
 0x1a2   : > { %v230_v63 = vrot.slane %v229_v62, 2 }
 0x1a4   : > { %v231_v0 = vadd.f32 %v230_v63, %v229_v62 }
 0x1a6   : > { %v232_v1 = vrot.slane %v231_v0, 1 }
 0x1a8   : > { %v233_v2 = vadd.f32 %v232_v1, %v231_v0 }
 0x1aa   : > { %235 = vst.msk [vmem:[%s135_s29] sm:$0x1] %vm234_vm8, %v233_v2 }
 0x1ab   : > { %437 = shalt.err (!%p434_p7)
}
 0x1ac   : > { %331 = dma.vmem_to_hbm [thread:$0]  (%p539_p11), %s248_s30, 16, %s250_s2, %s237_s3  }
 0x1ad PF: > { %s261_s20 = sand.u32 1, %s464_s6   ;;  %p338_p8 = pnand %p317_p9, %p543_p12 }
 0x1ae   : > { %s262_s21 = scalar_lea.sflag [#allocation4], %s261_s20 }
 0x1af   : > { %p339_p10 = pneg %p338_p8 }
 0x1b1   : > { %459 = dma.done.wait (%p339_p10), %s262_s21, 16  }
 0x1b2   : > { %461 = vsyncadd (%p339_p10), %s262_s21, 4294967280  ;;  %p14_p0 = scmp.ge.s32.totalorder %s518_s12, 4   ;;  %s621_s6 = smov %s468_s7 }
 0x1b3   : > { %s622_s7 = smov %s472_s8  ;;  %s623_s8 = smov %s530_s15 }
 0x1b4   : > { %s624_s9 = smov %s518_s12  ;;  %16 = sbr.rel (!%p14_p0) target bundleno = 5 (0x5), region = 71 }
 0x1b9   :  { %267 = vsyncpa [#allocation3], 1 }
 0x1ba   :  { %269 = vsyncpa [#allocation3 + $0x1], 1 }
 0x1bb   :  { %270 = vsyncpa [#allocation4], 1 }
 0x1bc   :  { %272 = vsyncpa [#allocation4 + $0x1], 1 }

</bundles_post_ra>
